<compile_context>
chip_gen: v7x
topology: tpu7x:2x2x1
jax: 0.10.0
libtpu: 0.0.40
codegen_flags: <defaults>
</compile_context>

<pallas_src>
import functools

import jax
import jax.numpy as jnp
from jax.experimental import pallas as pl
from jax.experimental.pallas import tpu as pltpu


# ----------------------------------------------------------------------------
# Chip detection helpers (all best-effort; failures fall back to safe choices)
# ----------------------------------------------------------------------------
def _chip_name():
    parts = []
    try:
        parts.append(str(jax.devices()[0].device_kind))
    except Exception:
        pass
    try:
        parts.append(str(pltpu.get_tpu_info()))
    except Exception:
        pass
    return " ".join(parts).lower()


def _bf16_compute_ok():
    # v6e / v7x have bf16-capable VPU + EUP; keep f32 compute everywhere else.
    name = _chip_name()
    return any(g in name for g in ("v6", "v7"))


def _num_tensorcores():
    # v7x has 2 TensorCores per chip; v5e / v6e have 1.
    return 2 if "v7" in _chip_name() else 1


def _vmem_capacity_bytes():
    try:
        return int(pltpu.get_tpu_info().vmem_capacity_bytes)
    except Exception:
        return 64 * 1024 * 1024  # conservative (v7x per-TC physical)


def _round_up(x, m):
    return ((x + m - 1) // m) * m


# ----------------------------------------------------------------------------
# Kernel
# ----------------------------------------------------------------------------
def _make_ce_kernel(n_heads, eos_index, eos_coef, upcast):
    """Weighted CE (reduction='sum') over all heads + positive-target count.

    Grid is (n_cores, row_tiles).  Per-core partial sums accumulate in VMEM
    scratch and are written once, at the last row tile, into output slot c.
    """

    def kernel(*refs):
        tgt_ref = refs[0]                                    # (tm, 1) i32
        head_refs = refs[1:1 + n_heads]                      # each (tm, C)
        loss_refs = refs[1 + n_heads:1 + 2 * n_heads]        # each (1,1,1) f32
        pos_ref = refs[1 + 2 * n_heads]                      # (1,1,1) f32
        acc_refs = refs[2 + 2 * n_heads:2 + 3 * n_heads]     # (1,1) f32 scratch
        cnt_ref = refs[2 + 3 * n_heads]                      # (1,1) f32 scratch

        i = pl.program_id(1)
        last = pl.num_programs(1) - 1

        @pl.when(i == 0)
        def _init():
            for acc in acc_refs:
                acc[...] = jnp.zeros_like(acc)
            cnt_ref[...] = jnp.zeros_like(cnt_ref)

        tgt = tgt_ref[...]                                   # (tm, 1) i32
        tm = tgt.shape[0]
        c = head_refs[0].shape[1]

        # PyTorch cross_entropy ignore_index: padded / ignored rows are -100.
        valid = tgt >= 0                                     # (tm, 1) bool
        # empty_weight == 1 everywhere except the EOS (last vocab) class.
        w_t = jnp.where(tgt == eos_index,
                        jnp.float32(eos_coef), jnp.float32(1.0))
        # num_pos counts target entries > -1 (== valid for int targets).
        cnt_ref[...] = cnt_ref[...] + jnp.sum(valid.astype(jnp.float32))

        # Hoisted target-only work, shared by every head (JAX does not CSE
        # iota/broadcast, so keep this outside the per-head loop).
        col = jax.lax.broadcasted_iota(jnp.int32, (tm, c), 1)
        match = col == tgt                                   # (tm, c) bool

        for h in range(n_heads):
            logits = head_refs[h][...]                       # native dtype
            if upcast:
                logits = logits.astype(jnp.float32)

            # Numerically stable logsumexp over the vocab (lane) axis.
            # max / shift / exp run in the native dtype (bf16 on v6e/v7x);
            # reductions accumulate in f32.
            m = jnp.max(logits, axis=-1, keepdims=True)
            ex = jnp.exp(logits - m)
            sumexp = jnp.sum(ex, axis=-1, keepdims=True, dtype=jnp.float32)
            lse = m.astype(jnp.float32) + jnp.log(sumexp)

            # Target logit via masked select-sum (exactly one match per valid
            # row, so the f32 accumulation is exact).
            logit_t = jnp.sum(jnp.where(match, logits, 0), axis=-1,
                              keepdims=True, dtype=jnp.float32)

            # Garbage logits in ragged / ghost rows are dropped by the select.
            per_row = jnp.where(valid, w_t * (lse - logit_t), 0.0)
            acc_refs[h][...] = acc_refs[h][...] + jnp.sum(per_row)

        @pl.when(i == last)
        def _finalize():
            for h in range(n_heads):
                loss_refs[h][0, :, :] = acc_refs[h][...]
            pos_ref[0, :, :] = cnt_ref[...]

    return kernel


# ----------------------------------------------------------------------------
# VMEM budgeting (inputs + in-kernel temporaries)
# ----------------------------------------------------------------------------
def _per_row_vmem_bytes(c, n_heads, in_itemsize, cmp_itemsize):
    return (n_heads * 2 * c * in_itemsize        # double-buffered logits blocks
            + 3 * c * cmp_itemsize               # exp / shift / select temps
            + 2 * c * 4                          # hoisted iota + match mask
            + 2 * 128 * 4)                       # double-buffered target block


def _pick_row_tile(n_rows, c, n_heads, in_itemsize, cmp_itemsize):
    cap = _vmem_capacity_bytes()
    budget = int(cap * 0.45)                     # headroom for compiler scratch
    per_row = _per_row_vmem_bytes(c, n_heads, in_itemsize, cmp_itemsize)
    tm = budget // max(per_row, 1)
    tm = min(tm, 1024, _round_up(max(n_rows, 1), 8))
    tm = max(8, (tm // 8) * 8)
    return int(tm)


# ----------------------------------------------------------------------------
# Wrapper
# ----------------------------------------------------------------------------
@functools.partial(
    jax.jit,
    static_argnames=("num_vocal", "eos_coef", "tm", "upcast", "vmem_limit",
                     "n_cores"))
def _ce_fused_pallas(targets1d, logits_list, *, num_vocal, eos_coef, tm,
                     upcast, vmem_limit, n_cores):
    """Returns (per-head weighted CE sums (H,), count of targets > -1)."""
    n_heads = len(logits_list)
    n = targets1d.shape[0]

    n_tiles = -(-n // tm)                        # real logits row tiles
    tiles_per_core = -(-n_tiles // n_cores)
    n_pad_t = n_cores * tiles_per_core * tm      # pad ONLY the tiny targets
    last_tile = n_tiles - 1

    tgt = targets1d.astype(jnp.int32).reshape(n, 1)
    if n_pad_t != n:
        tgt = jnp.pad(tgt, ((0, n_pad_t - n), (0, 0)), constant_values=-100)

    # No reshuffling / padding of the logits: reshape is metadata only.
    heads = [lg.reshape(n, num_vocal) for lg in logits_list]

    def tgt_map(c_idx, i):
        return (c_idx * tiles_per_core + i, 0)

    def head_map(c_idx, i):
        # Ghost tiles (beyond the real range) re-read the last real tile; the
        # -100-padded targets mask their contribution to 0.
        return (jnp.minimum(c_idx * tiles_per_core + i, last_tile), 0)

    def out_map(c_idx, i):
        return (c_idx, 0, 0)

    in_specs = [pl.BlockSpec((tm, 1), tgt_map)]
    in_specs += [pl.BlockSpec((tm, num_vocal), head_map)
                 for _ in range(n_heads)]
    out_shape = tuple(jax.ShapeDtypeStruct((n_cores, 1, 1), jnp.float32)
                      for _ in range(n_heads + 1))
    out_specs = [pl.BlockSpec((1, 1, 1), out_map)
                 for _ in range(n_heads + 1)]
    scratch = [pltpu.VMEM((1, 1), jnp.float32) for _ in range(n_heads + 1)]

    kernel = _make_ce_kernel(n_heads, num_vocal - 1, float(eos_coef),
                             bool(upcast))

    outs = pl.pallas_call(
        kernel,
        out_shape=out_shape,
        grid_spec=pltpu.PrefetchScalarGridSpec(
            num_scalar_prefetch=0,
            grid=(n_cores, tiles_per_core),
            in_specs=in_specs,
            out_specs=out_specs,
            scratch_shapes=scratch),
        compiler_params=pltpu.CompilerParams(
            dimension_semantics=("parallel", "arbitrary"),
            vmem_limit_bytes=vmem_limit),
    )(tgt, *heads)

    # Sum per-core partials.
    loss_sums = jnp.stack([jnp.sum(o) for o in outs[:n_heads]])
    pos = jnp.sum(outs[n_heads])
    return loss_sums, pos


# ----------------------------------------------------------------------------
# Module port
# ----------------------------------------------------------------------------
class SetCriterionPallas:
    """JAX / Pallas port of pix2seq SetCriterion (loss_type='ce')."""

    def __init__(self, num_classes, weight_dict, num_vocal, eos_coef,
                 loss_type="ce", focal_alpha=0.25, num_bins=500):
        self.num_classes = num_classes
        self.weight_dict = weight_dict
        self.num_vocal = num_vocal
        self.loss_type = loss_type
        self.focal_alpha = focal_alpha
        self.num_bins = num_bins
        self.eos_coef = float(eos_coef)
        # empty_weight buffer (kept for parity / reference checking).
        self.empty_weight = jnp.ones((num_vocal,), jnp.float32).at[-1].set(eos_coef)

    def forward(self, outputs, target_seq):
        if self.loss_type != "ce":
            # TODO(synk): 'ce_specific' and 'focal' branches not implemented.
            raise KeyError("only loss_type='ce' is implemented")

        # TODO(synk): eval-time list-of-logits input format not implemented.
        pred_seq_logits = outputs["pred_seq_logits"]
        B, L, C = pred_seq_logits.shape
        assert C == self.num_vocal

        heads = [pred_seq_logits] + list(outputs.get("aux_seq_logits", []))
        tgt1d = target_seq.reshape(-1)
        n = int(tgt1d.shape[0])

        in_isz = jnp.dtype(pred_seq_logits.dtype).itemsize
        upcast = (in_isz < 4) and not _bf16_compute_ok()
        cmp_isz = 4 if (upcast or in_isz >= 4) else in_isz

        tm = _pick_row_tile(n, C, len(heads), in_isz, cmp_isz)
        n_tiles = -(-n // tm)
        n_cores = max(1, min(_num_tensorcores(), n_tiles))

        cap = _vmem_capacity_bytes()
        need = _per_row_vmem_bytes(C, len(heads), in_isz, cmp_isz) * tm
        vmem_limit = int(min(cap, max(need + (8 << 20), 32 << 20)))

        loss_sums, pos = _ce_fused_pallas(
            tgt1d, tuple(heads),
            num_vocal=self.num_vocal, eos_coef=self.eos_coef,
            tm=tm, upcast=upcast, vmem_limit=vmem_limit, n_cores=n_cores)

        # TODO(synk): distributed all_reduce of num_pos / world_size division.
        num_pos = jnp.maximum(pos, 1.0)

        losses = {"loss_seq": loss_sums[0] / num_pos}
        if "aux_seq_logits" in outputs:
            for i in range(len(outputs["aux_seq_logits"])):
                losses["loss_%d" % i] = loss_sums[i + 1] / num_pos
        return losses


# ----------------------------------------------------------------------------
# Pure-JAX reference
# ----------------------------------------------------------------------------
def _ce_reference(logits2d, targets1d, weight):
    """Weighted CE (reduction='sum', ignore_index<0) + positive count."""
    logits2d = logits2d.astype(jnp.float32)
    lse = jax.nn.logsumexp(logits2d, axis=-1)
    safe_t = jnp.clip(targets1d, 0, logits2d.shape[-1] - 1)
    logit_t = jnp.take_along_axis(logits2d, safe_t[:, None], axis=-1)[:, 0]
    w_t = weight[safe_t]
    valid = (targets1d >= 0).astype(jnp.float32)
    loss_sum = jnp.sum(valid * w_t * (lse - logit_t))
    pos = jnp.sum((targets1d > -1).astype(jnp.float32))
    return loss_sum, pos


if __name__ == "__main__":
    key = jax.random.PRNGKey(0)
    B, L = 2, 8
    num_vocal = 192            # deliberately not a multiple of 128 lanes
    num_classes = 91
    eos_coef = 0.1

    k_pred, k_tgt, k_mask, k_aux0, k_aux1 = jax.random.split(key, 5)
    pred_seq_logits = jax.random.normal(k_pred, (B, L, num_vocal), jnp.float32)
    aux_logits = [
        jax.random.normal(k_aux0, (B, L, num_vocal), jnp.float32),
        jax.random.normal(k_aux1, (B, L, num_vocal), jnp.float32),
    ]

    target_seq = jax.random.randint(k_tgt, (B, L), 0, num_vocal, jnp.int32)
    # a few ignored positions (ignore_index = -100, also excluded from num_pos)
    mask = jax.random.uniform(k_mask, (B, L)) < 0.2
    target_seq = jnp.where(mask, jnp.int32(-100), target_seq)

    criterion = SetCriterionPallas(
        num_classes=num_classes, weight_dict={"loss_seq": 1.0},
        num_vocal=num_vocal, eos_coef=eos_coef, loss_type="ce")

    outputs = {"pred_seq_logits": pred_seq_logits, "aux_seq_logits": aux_logits}
    losses = criterion.forward(outputs, target_seq)
    jax.block_until_ready(losses)

    # ---- f32 reference check ----------------------------------------------
    ref_sum, ref_pos = _ce_reference(
        pred_seq_logits.reshape(-1, num_vocal), target_seq.reshape(-1),
        criterion.empty_weight)
    ref_num_pos = jnp.maximum(ref_pos, 1.0)
    assert jnp.allclose(losses["loss_seq"], ref_sum / ref_num_pos,
                        rtol=1e-5, atol=1e-5), (losses["loss_seq"],
                                                ref_sum / ref_num_pos)
    for i, aux in enumerate(aux_logits):
        aux_sum, _ = _ce_reference(aux.reshape(-1, num_vocal),
                                   target_seq.reshape(-1),
                                   criterion.empty_weight)
        assert jnp.allclose(losses["loss_%d" % i], aux_sum / ref_num_pos,
                            rtol=1e-5, atol=1e-5), (losses["loss_%d" % i],
                                                    aux_sum / ref_num_pos)

    # ---- explicit 2-core-partial path (serialises on 1-TC chips) ----------
    # tm == n  ->  core 1 sees only ghost tiles (clamped block, -100 targets).
    loss2, pos2 = _ce_fused_pallas(
        target_seq.reshape(-1),
        tuple([pred_seq_logits] + aux_logits),
        num_vocal=num_vocal, eos_coef=eos_coef,
        tm=16, upcast=False, vmem_limit=32 << 20, n_cores=2)
    jax.block_until_ready((loss2, pos2))
    assert jnp.allclose(loss2[0] / jnp.maximum(pos2, 1.0),
                        ref_sum / ref_num_pos, rtol=1e-5, atol=1e-5)

    # ---- ragged last tile (rows beyond n masked via -100-padded targets) --
    n_r = 10
    loss_r, pos_r = _ce_fused_pallas(
        target_seq.reshape(-1)[:n_r],
        tuple(h.reshape(-1, num_vocal)[:n_r]
              for h in [pred_seq_logits] + aux_logits),
        num_vocal=num_vocal, eos_coef=eos_coef,
        tm=8, upcast=False, vmem_limit=32 << 20, n_cores=1)
    jax.block_until_ready((loss_r, pos_r))
    rag_sum, rag_pos = _ce_reference(
        pred_seq_logits.reshape(-1, num_vocal)[:n_r],
        target_seq.reshape(-1)[:n_r], criterion.empty_weight)
    assert jnp.allclose(loss_r[0] / jnp.maximum(pos_r, 1.0),
                        rag_sum / jnp.maximum(rag_pos, 1.0),
                        rtol=1e-5, atol=1e-5)

    # ---- bf16 smoke test: native-dtype DMA (+ bf16 compute on v6e/v7x) ----
    # Tolerance is loosened vs the f32 check because exp may run in bf16.
    outputs_bf16 = {
        "pred_seq_logits": pred_seq_logits.astype(jnp.bfloat16),
        "aux_seq_logits": [a.astype(jnp.bfloat16) for a in aux_logits],
    }
    losses_bf16 = criterion.forward(outputs_bf16, target_seq)
    jax.block_until_ready(losses_bf16)
    ref_sum_bf16, _ = _ce_reference(
        outputs_bf16["pred_seq_logits"].reshape(-1, num_vocal),
        target_seq.reshape(-1), criterion.empty_weight)
    assert jnp.allclose(losses_bf16["loss_seq"], ref_sum_bf16 / ref_num_pos,
                        rtol=2e-2, atol=2e-2), (losses_bf16["loss_seq"],
                                                ref_sum_bf16 / ref_num_pos)

    print("KERNEL_OK")
</pallas_src>

<mosaic_0001>
module attributes {stable_mosaic.version = 11 : i64} {
  func.func @kernel(%arg0: i32, %arg1: i32, %arg2: memref<16x1xi32, #tpu.memory_space<vmem>>, %arg3: memref<16x192xf32, #tpu.memory_space<vmem>>, %arg4: memref<16x192xf32, #tpu.memory_space<vmem>>, %arg5: memref<16x192xf32, #tpu.memory_space<vmem>>, %arg6: memref<1x1x1xf32, #tpu.memory_space<vmem>>, %arg7: memref<1x1x1xf32, #tpu.memory_space<vmem>>, %arg8: memref<1x1x1xf32, #tpu.memory_space<vmem>>, %arg9: memref<1x1x1xf32, #tpu.memory_space<vmem>>, %arg10: memref<1x1xf32, #tpu.memory_space<vmem>>, %arg11: memref<1x1xf32, #tpu.memory_space<vmem>>, %arg12: memref<1x1xf32, #tpu.memory_space<vmem>>, %arg13: memref<1x1xf32, #tpu.memory_space<vmem>>) attributes {dimension_semantics = [#tpu.dimension_semantics<parallel>, #tpu.dimension_semantics<arbitrary>], iteration_bounds = array<i64: 1, 1>, scalar_prefetch = 0 : i64, scratch_operands = 4 : i64, tpu.core_type = #tpu.core_type<tc>, window_params = [{transform_indices = @transform_0, window_bounds = array<i64: 16, 1>}, {transform_indices = @transform_1, window_bounds = array<i64: 16, 192>}, {transform_indices = @transform_2, window_bounds = array<i64: 16, 192>}, {transform_indices = @transform_3, window_bounds = array<i64: 16, 192>}, {transform_indices = @transform_4, window_bounds = array<i64: 1, 1, 1>}, {transform_indices = @transform_5, window_bounds = array<i64: 1, 1, 1>}, {transform_indices = @transform_6, window_bounds = array<i64: 1, 1, 1>}, {transform_indices = @transform_7, window_bounds = array<i64: 1, 1, 1>}]} {
    %c0_i32 = arith.constant 0 : i32
    %0 = arith.cmpi eq, %arg1, %c0_i32 : i32
    %1 = arith.extui %0 : i1 to i32
    %c0_i32_0 = arith.constant 0 : i32
    %2 = arith.cmpi ne, %1, %c0_i32_0 : i32
    scf.if %2 {
      %cst_47 = arith.constant 0.000000e+00 : f32
      %108 = vector.broadcast %cst_47 : f32 to vector<1x1xf32>
      %c0_48 = arith.constant 0 : index
      %c0_49 = arith.constant 0 : index
      %109 = vector.load %arg10[%c0_48, %c0_49] : memref<1x1xf32, #tpu.memory_space<vmem>>, vector<1x1xf32>
      tpu.vector_store %arg10[%c0_48, %c0_49], %108 {strides = array<i32>} : memref<1x1xf32, #tpu.memory_space<vmem>>, vector<1x1xf32>,
      %cst_50 = arith.constant 0.000000e+00 : f32
      %110 = vector.broadcast %cst_50 : f32 to vector<1x1xf32>
      %c0_51 = arith.constant 0 : index
      %c0_52 = arith.constant 0 : index
      %111 = vector.load %arg11[%c0_51, %c0_52] : memref<1x1xf32, #tpu.memory_space<vmem>>, vector<1x1xf32>
      tpu.vector_store %arg11[%c0_51, %c0_52], %110 {strides = array<i32>} : memref<1x1xf32, #tpu.memory_space<vmem>>, vector<1x1xf32>,
      %cst_53 = arith.constant 0.000000e+00 : f32
      %112 = vector.broadcast %cst_53 : f32 to vector<1x1xf32>
      %c0_54 = arith.constant 0 : index
      %c0_55 = arith.constant 0 : index
      %113 = vector.load %arg12[%c0_54, %c0_55] : memref<1x1xf32, #tpu.memory_space<vmem>>, vector<1x1xf32>
      tpu.vector_store %arg12[%c0_54, %c0_55], %112 {strides = array<i32>} : memref<1x1xf32, #tpu.memory_space<vmem>>, vector<1x1xf32>,
      %cst_56 = arith.constant 0.000000e+00 : f32
      %114 = vector.broadcast %cst_56 : f32 to vector<1x1xf32>
      %c0_57 = arith.constant 0 : index
      %c0_58 = arith.constant 0 : index
      %115 = vector.load %arg13[%c0_57, %c0_58] : memref<1x1xf32, #tpu.memory_space<vmem>>, vector<1x1xf32>
      tpu.vector_store %arg13[%c0_57, %c0_58], %114 {strides = array<i32>} : memref<1x1xf32, #tpu.memory_space<vmem>>, vector<1x1xf32>,
    } else {
    }
    %c0 = arith.constant 0 : index
    %c0_1 = arith.constant 0 : index
    %3 = vector.load %arg2[%c0, %c0_1] : memref<16x1xi32, #tpu.memory_space<vmem>>, vector<16x1xi32>
    %c0_i32_2 = arith.constant 0 : i32
    %4 = vector.broadcast %c0_i32_2 : i32 to vector<16x1xi32>
    %5 = arith.cmpi sge, %3, %4 : vector<16x1xi32>
    %c191_i32 = arith.constant 191 : i32
    %6 = vector.broadcast %c191_i32 : i32 to vector<16x1xi32>
    %7 = arith.cmpi eq, %3, %6 : vector<16x1xi32>
    %cst = arith.constant 1.000000e-01 : f32
    %cst_3 = arith.constant 1.000000e+00 : f32
    %8 = vector.broadcast %cst : f32 to vector<16x1xf32>
    %9 = vector.broadcast %cst_3 : f32 to vector<16x1xf32>
    %10 = arith.select %7, %8, %9 : vector<16x1xi1>, vector<16x1xf32>
    %c0_4 = arith.constant 0 : index
    %c0_5 = arith.constant 0 : index
    %11 = vector.load %arg13[%c0_4, %c0_5] : memref<1x1xf32, #tpu.memory_space<vmem>>, vector<1x1xf32>
    %12 = arith.extui %5 : vector<16x1xi1> to vector<16x1xi32>
    %13 = arith.sitofp %12 : vector<16x1xi32> to vector<16x1xf32>
    %14 = vector.shape_cast %13 : vector<16x1xf32> to vector<1x16x1xf32>
    %cst_6 = arith.constant dense<0.000000e+00> : vector<1xf32>
    %15 = vector.multi_reduction <add>, %14, %cst_6 [1, 2] : vector<1x16x1xf32> to vector<1xf32>
    %16 = vector.shape_cast %15 : vector<1xf32> to vector<1x1x1xf32>
    %17 = vector.extract %16[0, 0, 0] : f32 from vector<1x1x1xf32>
    %18 = vector.broadcast %17 : f32 to vector<1x1xf32>
    %19 = arith.addf %11, %18 : vector<1x1xf32>
    %c0_7 = arith.constant 0 : index
    %c0_8 = arith.constant 0 : index
    %20 = vector.load %arg13[%c0_7, %c0_8] : memref<1x1xf32, #tpu.memory_space<vmem>>, vector<1x1xf32>
    tpu.vector_store %arg13[%c0_7, %c0_8], %19 {strides = array<i32>} : memref<1x1xf32, #tpu.memory_space<vmem>>, vector<1x1xf32>,
    %21 = tpu.iota {dimensions = array<i32: 1>} : vector<16x192xi32>
    %22 = vector.broadcast %3 : vector<16x1xi32> to vector<16x192xi32>
    %23 = arith.cmpi eq, %21, %22 : vector<16x192xi32>
    %c0_9 = arith.constant 0 : index
    %c0_10 = arith.constant 0 : index
    %24 = vector.load %arg3[%c0_9, %c0_10] : memref<16x192xf32, #tpu.memory_space<vmem>>, vector<16x192xf32>
    %cst_11 = arith.constant dense<0xFF800000> : vector<16xf32>
    %25 = vector.multi_reduction <maximumf>, %24, %cst_11 [1] : vector<16x192xf32> to vector<16xf32>
    %26 = vector.shape_cast %25 : vector<16xf32> to vector<16x1xf32>
    %27 = vector.broadcast %26 : vector<16x1xf32> to vector<16x192xf32>
    %28 = arith.subf %24, %27 : vector<16x192xf32>
    %29 = math.exp %28 : vector<16x192xf32>
    %cst_12 = arith.constant dense<0.000000e+00> : vector<16xf32>
    %30 = vector.multi_reduction <add>, %29, %cst_12 [1] : vector<16x192xf32> to vector<16xf32>
    %31 = vector.shape_cast %30 : vector<16xf32> to vector<16x1xf32>
    %32 = math.log %31 : vector<16x1xf32>
    %33 = arith.addf %26, %32 : vector<16x1xf32>
    %c0_i32_13 = arith.constant 0 : i32
    %34 = arith.sitofp %c0_i32_13 : i32 to f32
    %35 = vector.broadcast %34 : f32 to vector<16x192xf32>
    %36 = arith.select %23, %24, %35 : vector<16x192xi1>, vector<16x192xf32>
    %cst_14 = arith.constant dense<0.000000e+00> : vector<16xf32>
    %37 = vector.multi_reduction <add>, %36, %cst_14 [1] : vector<16x192xf32> to vector<16xf32>
    %38 = vector.shape_cast %37 : vector<16xf32> to vector<16x1xf32>
    %39 = arith.subf %33, %38 : vector<16x1xf32>
    %40 = arith.mulf %10, %39 : vector<16x1xf32>
    %cst_15 = arith.constant 0.000000e+00 : f32
    %41 = vector.broadcast %cst_15 : f32 to vector<16x1xf32>
    %42 = arith.select %5, %40, %41 : vector<16x1xi1>, vector<16x1xf32>
    %c0_16 = arith.constant 0 : index
    %c0_17 = arith.constant 0 : index
    %43 = vector.load %arg10[%c0_16, %c0_17] : memref<1x1xf32, #tpu.memory_space<vmem>>, vector<1x1xf32>
    %44 = vector.shape_cast %42 : vector<16x1xf32> to vector<1x16x1xf32>
    %cst_18 = arith.constant dense<0.000000e+00> : vector<1xf32>
    %45 = vector.multi_reduction <add>, %44, %cst_18 [1, 2] : vector<1x16x1xf32> to vector<1xf32>
    %46 = vector.shape_cast %45 : vector<1xf32> to vector<1x1x1xf32>
    %47 = vector.extract %46[0, 0, 0] : f32 from vector<1x1x1xf32>
    %48 = vector.broadcast %47 : f32 to vector<1x1xf32>
    %49 = arith.addf %43, %48 : vector<1x1xf32>
    %c0_19 = arith.constant 0 : index
    %c0_20 = arith.constant 0 : index
    %50 = vector.load %arg10[%c0_19, %c0_20] : memref<1x1xf32, #tpu.memory_space<vmem>>, vector<1x1xf32>
    tpu.vector_store %arg10[%c0_19, %c0_20], %49 {strides = array<i32>} : memref<1x1xf32, #tpu.memory_space<vmem>>, vector<1x1xf32>,
    %c0_21 = arith.constant 0 : index
    %c0_22 = arith.constant 0 : index
    %51 = vector.load %arg4[%c0_21, %c0_22] : memref<16x192xf32, #tpu.memory_space<vmem>>, vector<16x192xf32>
    %cst_23 = arith.constant dense<0xFF800000> : vector<16xf32>
    %52 = vector.multi_reduction <maximumf>, %51, %cst_23 [1] : vector<16x192xf32> to vector<16xf32>
    %53 = vector.shape_cast %52 : vector<16xf32> to vector<16x1xf32>
    %54 = vector.broadcast %53 : vector<16x1xf32> to vector<16x192xf32>
    %55 = arith.subf %51, %54 : vector<16x192xf32>
    %56 = math.exp %55 : vector<16x192xf32>
    %cst_24 = arith.constant dense<0.000000e+00> : vector<16xf32>
    %57 = vector.multi_reduction <add>, %56, %cst_24 [1] : vector<16x192xf32> to vector<16xf32>
    %58 = vector.shape_cast %57 : vector<16xf32> to vector<16x1xf32>
    %59 = math.log %58 : vector<16x1xf32>
    %60 = arith.addf %53, %59 : vector<16x1xf32>
    %c0_i32_25 = arith.constant 0 : i32
    %61 = arith.sitofp %c0_i32_25 : i32 to f32
    %62 = vector.broadcast %61 : f32 to vector<16x192xf32>
    %63 = arith.select %23, %51, %62 : vector<16x192xi1>, vector<16x192xf32>
    %cst_26 = arith.constant dense<0.000000e+00> : vector<16xf32>
    %64 = vector.multi_reduction <add>, %63, %cst_26 [1] : vector<16x192xf32> to vector<16xf32>
    %65 = vector.shape_cast %64 : vector<16xf32> to vector<16x1xf32>
    %66 = arith.subf %60, %65 : vector<16x1xf32>
    %67 = arith.mulf %10, %66 : vector<16x1xf32>
    %cst_27 = arith.constant 0.000000e+00 : f32
    %68 = vector.broadcast %cst_27 : f32 to vector<16x1xf32>
    %69 = arith.select %5, %67, %68 : vector<16x1xi1>, vector<16x1xf32>
    %c0_28 = arith.constant 0 : index
    %c0_29 = arith.constant 0 : index
    %70 = vector.load %arg11[%c0_28, %c0_29] : memref<1x1xf32, #tpu.memory_space<vmem>>, vector<1x1xf32>
    %71 = vector.shape_cast %69 : vector<16x1xf32> to vector<1x16x1xf32>
    %cst_30 = arith.constant dense<0.000000e+00> : vector<1xf32>
    %72 = vector.multi_reduction <add>, %71, %cst_30 [1, 2] : vector<1x16x1xf32> to vector<1xf32>
    %73 = vector.shape_cast %72 : vector<1xf32> to vector<1x1x1xf32>
    %74 = vector.extract %73[0, 0, 0] : f32 from vector<1x1x1xf32>
    %75 = vector.broadcast %74 : f32 to vector<1x1xf32>
    %76 = arith.addf %70, %75 : vector<1x1xf32>
    %c0_31 = arith.constant 0 : index
    %c0_32 = arith.constant 0 : index
    %77 = vector.load %arg11[%c0_31, %c0_32] : memref<1x1xf32, #tpu.memory_space<vmem>>, vector<1x1xf32>
    tpu.vector_store %arg11[%c0_31, %c0_32], %76 {strides = array<i32>} : memref<1x1xf32, #tpu.memory_space<vmem>>, vector<1x1xf32>,
    %c0_33 = arith.constant 0 : index
    %c0_34 = arith.constant 0 : index
    %78 = vector.load %arg5[%c0_33, %c0_34] : memref<16x192xf32, #tpu.memory_space<vmem>>, vector<16x192xf32>
    %cst_35 = arith.constant dense<0xFF800000> : vector<16xf32>
    %79 = vector.multi_reduction <maximumf>, %78, %cst_35 [1] : vector<16x192xf32> to vector<16xf32>
    %80 = vector.shape_cast %79 : vector<16xf32> to vector<16x1xf32>
    %81 = vector.broadcast %80 : vector<16x1xf32> to vector<16x192xf32>
    %82 = arith.subf %78, %81 : vector<16x192xf32>
    %83 = math.exp %82 : vector<16x192xf32>
    %cst_36 = arith.constant dense<0.000000e+00> : vector<16xf32>
    %84 = vector.multi_reduction <add>, %83, %cst_36 [1] : vector<16x192xf32> to vector<16xf32>
    %85 = vector.shape_cast %84 : vector<16xf32> to vector<16x1xf32>
    %86 = math.log %85 : vector<16x1xf32>
    %87 = arith.addf %80, %86 : vector<16x1xf32>
    %c0_i32_37 = arith.constant 0 : i32
    %88 = arith.sitofp %c0_i32_37 : i32 to f32
    %89 = vector.broadcast %88 : f32 to vector<16x192xf32>
    %90 = arith.select %23, %78, %89 : vector<16x192xi1>, vector<16x192xf32>
    %cst_38 = arith.constant dense<0.000000e+00> : vector<16xf32>
    %91 = vector.multi_reduction <add>, %90, %cst_38 [1] : vector<16x192xf32> to vector<16xf32>
    %92 = vector.shape_cast %91 : vector<16xf32> to vector<16x1xf32>
    %93 = arith.subf %87, %92 : vector<16x1xf32>
    %94 = arith.mulf %10, %93 : vector<16x1xf32>
    %cst_39 = arith.constant 0.000000e+00 : f32
    %95 = vector.broadcast %cst_39 : f32 to vector<16x1xf32>
    %96 = arith.select %5, %94, %95 : vector<16x1xi1>, vector<16x1xf32>
    %c0_40 = arith.constant 0 : index
    %c0_41 = arith.constant 0 : index
    %97 = vector.load %arg12[%c0_40, %c0_41] : memref<1x1xf32, #tpu.memory_space<vmem>>, vector<1x1xf32>
    %98 = vector.shape_cast %96 : vector<16x1xf32> to vector<1x16x1xf32>
    %cst_42 = arith.constant dense<0.000000e+00> : vector<1xf32>
    %99 = vector.multi_reduction <add>, %98, %cst_42 [1, 2] : vector<1x16x1xf32> to vector<1xf32>
    %100 = vector.shape_cast %99 : vector<1xf32> to vector<1x1x1xf32>
    %101 = vector.extract %100[0, 0, 0] : f32 from vector<1x1x1xf32>
    %102 = vector.broadcast %101 : f32 to vector<1x1xf32>
    %103 = arith.addf %97, %102 : vector<1x1xf32>
    %c0_43 = arith.constant 0 : index
    %c0_44 = arith.constant 0 : index
    %104 = vector.load %arg12[%c0_43, %c0_44] : memref<1x1xf32, #tpu.memory_space<vmem>>, vector<1x1xf32>
    tpu.vector_store %arg12[%c0_43, %c0_44], %103 {strides = array<i32>} : memref<1x1xf32, #tpu.memory_space<vmem>>, vector<1x1xf32>,
    %c0_i32_45 = arith.constant 0 : i32
    %105 = arith.cmpi eq, %arg1, %c0_i32_45 : i32
    %106 = arith.extui %105 : i1 to i32
    %c0_i32_46 = arith.constant 0 : i32
    %107 = arith.cmpi ne, %106, %c0_i32_46 : i32
    scf.if %107 {
      %c0_47 = arith.constant 0 : index
      %c0_48 = arith.constant 0 : index
      %108 = vector.load %arg10[%c0_47, %c0_48] : memref<1x1xf32, #tpu.memory_space<vmem>>, vector<1x1xf32>
      %c0_49 = arith.constant 0 : index
      %c0_50 = arith.constant 0 : index
      %c0_51 = arith.constant 0 : index
      %109 = vector.load %arg6[%c0_49, %c0_50, %c0_51] : memref<1x1x1xf32, #tpu.memory_space<vmem>>, vector<1x1x1xf32>
      %110 = vector.shape_cast %109 : vector<1x1x1xf32> to vector<1x1xf32>
      %111 = vector.shape_cast %108 : vector<1x1xf32> to vector<1x1x1xf32>
      tpu.vector_store %arg6[%c0_49, %c0_50, %c0_51], %111 {strides = array<i32>} : memref<1x1x1xf32, #tpu.memory_space<vmem>>, vector<1x1x1xf32>,
      %c0_52 = arith.constant 0 : index
      %c0_53 = arith.constant 0 : index
      %112 = vector.load %arg11[%c0_52, %c0_53] : memref<1x1xf32, #tpu.memory_space<vmem>>, vector<1x1xf32>
      %c0_54 = arith.constant 0 : index
      %c0_55 = arith.constant 0 : index
      %c0_56 = arith.constant 0 : index
      %113 = vector.load %arg7[%c0_54, %c0_55, %c0_56] : memref<1x1x1xf32, #tpu.memory_space<vmem>>, vector<1x1x1xf32>
      %114 = vector.shape_cast %113 : vector<1x1x1xf32> to vector<1x1xf32>
      %115 = vector.shape_cast %112 : vector<1x1xf32> to vector<1x1x1xf32>
      tpu.vector_store %arg7[%c0_54, %c0_55, %c0_56], %115 {strides = array<i32>} : memref<1x1x1xf32, #tpu.memory_space<vmem>>, vector<1x1x1xf32>,
      %c0_57 = arith.constant 0 : index
      %c0_58 = arith.constant 0 : index
      %116 = vector.load %arg12[%c0_57, %c0_58] : memref<1x1xf32, #tpu.memory_space<vmem>>, vector<1x1xf32>
      %c0_59 = arith.constant 0 : index
      %c0_60 = arith.constant 0 : index
      %c0_61 = arith.constant 0 : index
      %117 = vector.load %arg8[%c0_59, %c0_60, %c0_61] : memref<1x1x1xf32, #tpu.memory_space<vmem>>, vector<1x1x1xf32>
      %118 = vector.shape_cast %117 : vector<1x1x1xf32> to vector<1x1xf32>
      %119 = vector.shape_cast %116 : vector<1x1xf32> to vector<1x1x1xf32>
      tpu.vector_store %arg8[%c0_59, %c0_60, %c0_61], %119 {strides = array<i32>} : memref<1x1x1xf32, #tpu.memory_space<vmem>>, vector<1x1x1xf32>,
      %c0_62 = arith.constant 0 : index
      %c0_63 = arith.constant 0 : index
      %120 = vector.load %arg13[%c0_62, %c0_63] : memref<1x1xf32, #tpu.memory_space<vmem>>, vector<1x1xf32>
      %c0_64 = arith.constant 0 : index
      %c0_65 = arith.constant 0 : index
      %c0_66 = arith.constant 0 : index
      %121 = vector.load %arg9[%c0_64, %c0_65, %c0_66] : memref<1x1x1xf32, #tpu.memory_space<vmem>>, vector<1x1x1xf32>
      %122 = vector.shape_cast %121 : vector<1x1x1xf32> to vector<1x1xf32>
      %123 = vector.shape_cast %120 : vector<1x1xf32> to vector<1x1x1xf32>
      tpu.vector_store %arg9[%c0_64, %c0_65, %c0_66], %123 {strides = array<i32>} : memref<1x1x1xf32, #tpu.memory_space<vmem>>, vector<1x1x1xf32>,
    } else {
    }
    return
  }
  func.func @transform_0(%arg0: i32, %arg1: i32) -> (i32, i32) {
    %c1_i32 = arith.constant 1 : i32
    %0 = arith.muli %arg0, %c1_i32 : i32
    %1 = arith.addi %0, %arg1 : i32
    %c0_i32 = arith.constant 0 : i32
    %c0_i32_0 = arith.constant 0 : i32
    return %1, %c0_i32 : i32, i32
  }
  func.func @transform_1(%arg0: i32, %arg1: i32) -> (i32, i32) {
    %c1_i32 = arith.constant 1 : i32
    %0 = arith.muli %arg0, %c1_i32 : i32
    %1 = arith.addi %0, %arg1 : i32
    %c0_i32 = arith.constant 0 : i32
    %2 = arith.minsi %1, %c0_i32 : i32
    %c0_i32_0 = arith.constant 0 : i32
    %c0_i32_1 = arith.constant 0 : i32
    return %2, %c0_i32_0 : i32, i32
  }
  func.func @transform_2(%arg0: i32, %arg1: i32) -> (i32, i32) {
    %c1_i32 = arith.constant 1 : i32
    %0 = arith.muli %arg0, %c1_i32 : i32
    %1 = arith.addi %0, %arg1 : i32
    %c0_i32 = arith.constant 0 : i32
    %2 = arith.minsi %1, %c0_i32 : i32
    %c0_i32_0 = arith.constant 0 : i32
    %c0_i32_1 = arith.constant 0 : i32
    return %2, %c0_i32_0 : i32, i32
  }
  func.func @transform_3(%arg0: i32, %arg1: i32) -> (i32, i32) {
    %c1_i32 = arith.constant 1 : i32
    %0 = arith.muli %arg0, %c1_i32 : i32
    %1 = arith.addi %0, %arg1 : i32
    %c0_i32 = arith.constant 0 : i32
    %2 = arith.minsi %1, %c0_i32 : i32
    %c0_i32_0 = arith.constant 0 : i32
    %c0_i32_1 = arith.constant 0 : i32
    return %2, %c0_i32_0 : i32, i32
  }
  func.func @transform_4(%arg0: i32, %arg1: i32) -> (i32, i32, i32) {
    %c0_i32 = arith.constant 0 : i32
    %c0_i32_0 = arith.constant 0 : i32
    %c0_i32_1 = arith.constant 0 : i32
    return %arg0, %c0_i32, %c0_i32_0 : i32, i32, i32
  }
  func.func @transform_5(%arg0: i32, %arg1: i32) -> (i32, i32, i32) {
    %c0_i32 = arith.constant 0 : i32
    %c0_i32_0 = arith.constant 0 : i32
    %c0_i32_1 = arith.constant 0 : i32
    return %arg0, %c0_i32, %c0_i32_0 : i32, i32, i32
  }
  func.func @transform_6(%arg0: i32, %arg1: i32) -> (i32, i32, i32) {
    %c0_i32 = arith.constant 0 : i32
    %c0_i32_0 = arith.constant 0 : i32
    %c0_i32_1 = arith.constant 0 : i32
    return %arg0, %c0_i32, %c0_i32_0 : i32, i32, i32
  }
  func.func @transform_7(%arg0: i32, %arg1: i32) -> (i32, i32, i32) {
    %c0_i32 = arith.constant 0 : i32
    %c0_i32_0 = arith.constant 0 : i32
    %c0_i32_1 = arith.constant 0 : i32
    return %arg0, %c0_i32, %c0_i32_0 : i32, i32, i32
  }
}

</mosaic_0001>

<bundles_post_ra>
// kernel: _ce_fused_pallas.1
= control target key start
LH: loop header
LB: loop body
LE: loop exit
PB: predicated region body
PF: predicated region fallthrough
CT: control target
= control target key end

     0   :  { %13 = vsyncpa [#allocation7], 0  ;;  %s1013_s0 = inlined_call_operand.vmem [shape: s32[16,1], index: 0, kind: input, shape index: {}]   ;;  %s1014_s1 = inlined_call_operand.vmem [shape: f32[16,192], index: 1, kind: input, shape index: {}]   ;;  %s1015_s2 = inlined_call_operand.hbm [shape: f32[16,192], index: 2, kind: input, shape index: {}]   ;;  %s1016_s3 = inlined_call_operand.hbm [shape: f32[16,192], index: 3, kind: input, shape index: {}]   ;;  %s1017_s4 = inlined_call_operand.hbm [shape: f32[1,1,1], index: 4, kind: output, shape index: {0}]   ;;  %s1018_s5 = inlined_call_operand.hbm [shape: f32[1,1,1], index: 5, kind: output, shape index: {1}]   ;;  %s1019_s6 = inlined_call_operand.hbm [shape: f32[1,1,1], index: 6, kind: output, shape index: {2}]   ;;  %s1020_s7 = inlined_call_operand.hbm [shape: f32[1,1,1], index: 7, kind: output, shape index: {3}]  }
   0x1   :  { %14 = vsyncpa [#allocation10], 0 }
   0x2   :  { %15 = vsyncpa [#allocation8], 0 }
   0x3   :  { %16 = vsyncpa [#allocation13], 0 }
   0x4   :  { %17 = vsyncpa [#allocation16], 0  ;;  %s685_s24 = smov [#allocation6]   ;;  %s543_s28 = scalar_lea.hbm %s1015_s2, 512 }
   0x5   :  { %s55_s25 = sshll.u32 %s685_s24, 4  ;;  %p544_p0 = scmp.ne.s32.totalorder %s1015_s2, %s543_s28  ;;  %s56_s25 = int_to_ptr.vmem [resolvable:$true] %s55_s25 }
   0x6   :  { %p547_p1 = scmp.lt.u32.totalorder %s543_s28, %s1015_s2 }
   0x8   :  { %p549_p2 = pnand %p547_p1, %p544_p0 }
   0xa   :  { %552 = shalt.err (!%p549_p2)
}
   0xb   :  { %s553_s10 = scalar_lea.vmem %s56_s25, 512  ;;  %p558_p4 = scmp.lt.s32.totalorder %s56_s25, %s56_s25 }
   0xc   :  { %p554_p3 = scmp.ne.s32.totalorder %s56_s25, %s553_s10  ;;  %p559_p5 = scmp.lt.s32.totalorder %s553_s10, %s553_s10 }
   0xe   :  { %p560_p6 = por %p559_p5, %p558_p4 }
  0x10   :  { %p561_p7 = pnand %p560_p6, %p554_p3 }
  0x12   :  { %564 = shalt.err (!%p561_p7)
}
  0x13   :  { %s686_s11 = smov 256   ;;  %s687_s12 = smov 16  }
  0x14   :  { %61 = dma.hbm_to_vmem [thread:$0]  %s1015_s2, 512, %s56_s25, [#allocation7], %s686_s11, %s686_s11, %s687_s12  }
  0x15   :  { %s688_s15 = smov [#allocation9]   ;;  %s565_s19 = scalar_lea.hbm %s1016_s3, 512 }
  0x16   :  { %s74_s16 = sshll.u32 %s688_s15, 4  ;;  %p566_p8 = scmp.ne.s32.totalorder %s1016_s3, %s565_s19  ;;  %s75_s16 = int_to_ptr.vmem [resolvable:$true] %s74_s16 }
  0x17   :  { %p569_p9 = scmp.lt.u32.totalorder %s565_s19, %s1016_s3 }
  0x19   :  { %p571_p10 = pnand %p569_p9, %p566_p8 }
  0x1b   :  { %574 = shalt.err (!%p571_p10)
}
  0x1c   :  { %s575_s24 = scalar_lea.vmem %s75_s16, 512  ;;  %p580_p12 = scmp.lt.s32.totalorder %s75_s16, %s75_s16 }
  0x1d   :  { %p576_p11 = scmp.ne.s32.totalorder %s75_s16, %s575_s24  ;;  %p581_p13 = scmp.lt.s32.totalorder %s575_s24, %s575_s24 }
  0x1f   :  { %p582_p0 = por %p581_p13, %p580_p12 }
  0x21   :  { %p583_p1 = pnand %p582_p0, %p576_p11 }
  0x23   :  { %586 = shalt.err (!%p583_p1)
}
  0x24   :  { %80 = dma.hbm_to_vmem [thread:$0]  %s1016_s3, 512, %s75_s16, [#allocation10], %s686_s11, %s686_s11, %s687_s12  }
  0x25   :  { %675 = dma.done.wait [#allocation7], 512  }
  0x26   :  { %676 = vsyncadd [#allocation7], 4294966784 }
  0x27   :  { %677 = dma.done.wait [#allocation10], 512  }
  0x28   :  { %678 = vsyncadd [#allocation10], 4294966784  ;;  %v689_v0 = vmov 0   ;;  %vm187_vm0 = vcmask 523264   ;;  %v763_v1 = vld [vmem:[%s1014_s1] sm:$0xff]  ;;  %v768_v2 = vld [vmem:[%s1014_s1 + $0x8] sm:$0xff]  ;;  %v170_v41 = vlaneseq }
  0x29   :  { %505 = vset.pattern.permute.xlu0 %v689_v0  ;;  %506 = vset.pattern.permute.xlu1 %v689_v0  ;;  %v770_v3 = vld [vmem:[#allocation6] sm:$0xff]  ;;  %v188_v4 = vsel %vm187_vm0, %v768_v2, -inf  ;;  %v774_v5 = vld [vmem:[#allocation6 + $0x8] sm:$0xff]  ;;  %v784_v7 = vld [vmem:[%s1014_s1 + $0x18] sm:$0xff]  ;;  %vm153_vm7 = vcmask 7168   ;;  %vm135_vm10 = vcmask 0  }
  0x2a   :  { %v779_v6 = vld [vmem:[%s1014_s1 + $0x10] sm:$0xff]  ;;  %v189_v8 = vmax.f32 %v763_v1, %v188_v4  ;;  %v260_v9 = vsel %vm187_vm0, %v774_v5, -inf  ;;  %v192_v10 = vsel %vm187_vm0, %v784_v7, -inf  ;;  %v793_v12 = vld [vmem:[#allocation6 + $0x18] sm:$0xff]  ;;  %v804_v19 = vld [vmem:[#allocation9] sm:$0xff]  ;;  %v858_v52 = vand.u32 127, %v170_v41 }
  0x2b   :  { %v791_v11 = vld [vmem:[#allocation6 + $0x10] sm:$0xff]  ;;  %v261_v13 = vmax.f32 %v770_v3, %v260_v9  ;;  %v264_v14 = vsel %vm187_vm0, %v793_v12, -inf  ;;  %v798_v15 = vld [vmem:[#allocation9 + $0x8] sm:$0xff]  ;;  %v800_v16 = vld [vmem:[#allocation9 + $0x18] sm:$0xff]  ;;  %v193_v17 = vmax.f32 %v779_v6, %v192_v10  ;;  %s692_s13 = smov [#allocation15]  }
  0x2c   :  { %190 = vmax.xlane.f32.xlu0 %v189_v8  ;;  %v265_v18 = vmax.f32 %v791_v11, %v264_v14  ;;  %v332_v20 = vsel %vm187_vm0, %v798_v15, -inf  ;;  %v808_v21 = vld [vmem:[#allocation9 + $0x10] sm:$0xff]  ;;  %v336_v22 = vsel %vm187_vm0, %v800_v16, -inf  ;;  %v817_v25 = vld [vmem:[%s1013_s0 + $0x8] sm:$0xff]  ;;  %v823_v26 = vld [vmem:[%s1013_s0] sm:$0xff]  ;;  %v865_v58 = vadd.s32 128, %v858_v52 }
  0x2d   :  { %262 = vmax.xlane.f32.xlu1 %v261_v13  ;;  %v333_v23 = vmax.f32 %v804_v19, %v332_v20  ;;  %v337_v24 = vmax.f32 %v808_v21, %v336_v22  ;;  %vm143_vm5 = vcmp.ge.s32.totalorder %v817_v25, 0  ;;  %vm142_vm6 = vcmp.ge.s32.totalorder %v823_v26, 0  ;;  %s447_s14 = sshll.u32 %s692_s13, 4  ;;  %s448_s14 = int_to_ptr.vmem [resolvable:$true] %s447_s14 }
  0x2e   :  { %vm144_vm8 = vcmp.eq.s32.totalorder %v823_v26, 191  ;;  %vm145_vm9 = vcmp.eq.s32.totalorder %v817_v25, 191  ;;  %s587_s15 = scalar_lea.vmem %s448_s14, 16  ;;  %s591_s16 = scalar_lea.vmem %s448_s14, 32 }
  0x2f   :  { %p588_p2 = scmp.ne.s32.totalorder %s448_s14, %s587_s15  ;;  %p592_p3 = scmp.lt.s32.totalorder %s448_s14, %s448_s14 }
  0x30   :  { %194 = vmax.xlane.f32.xlu0 %v193_v17  ;;  %p593_p4 = scmp.lt.s32.totalorder %s591_s16, %s587_s15 }
  0x31   :  { %266 = vmax.xlane.f32.xlu1 %v265_v18 }
  0x32   :  { %p594_p5 = por %p593_p4, %p592_p3 }
  0x34   :  { %334 = vmax.xlane.f32.xlu0 %v333_v23  ;;  %p595_p6 = pnand %p594_p5, %p588_p2 }
  0x35   :  { %338 = vmax.xlane.f32.xlu1 %v337_v24 }
  0x46   :  { %177 = vperm.xlu1 %506, %v817_v25  }
  0x4a   :  { %174 = vperm.xlu0 %505, %v823_v26  }
  0xb9   :  { %v826_v27 = vpop.xlane.xlu0 %190 }
  0xba   :  { %v196_v28 = vsub.f32 %v763_v1, %v826_v27  ;;  %v197_v29 = vsub.f32 %v768_v2, %v826_v27  ;;  %v832_v30 = vpop.xlane.xlu1 %262 }
  0xbb   :  { %v268_v31 = vsub.f32 %v770_v3, %v832_v30  ;;  %v269_v32 = vsub.f32 %v774_v5, %v832_v30 }
  0xbc   :  { %v200_v33 = vmul.f32 1.442695, %v196_v28  ;;  %v202_v34 = vmul.f32 1.442695, %v197_v29 }
  0xbd   :  { %v272_v35 = vmul.f32 1.442695, %v268_v31  ;;  %v274_v36 = vmul.f32 1.442695, %v269_v32  ;;  %v838_v37 = vpop.xlane.xlu0 %194 }
  0xbe   :  { %507 = vpow2.f32 %v200_v33  ;;  %v198_v38 = vsub.f32 %v779_v6, %v838_v37  ;;  %v199_v39 = vsub.f32 %v784_v7, %v838_v37  ;;  %v844_v40 = vpop.xlane.xlu1 %266 }
  0xbf   :  { %509 = vpow2.f32 %v202_v34  ;;  %v270_v42 = vsub.f32 %v791_v11, %v844_v40  ;;  %v271_v43 = vsub.f32 %v793_v12, %v844_v40 }
  0xc0   :  { %511 = vpow2.f32 %v272_v35  ;;  %v204_v44 = vmul.f32 1.442695, %v198_v38  ;;  %v206_v45 = vmul.f32 1.442695, %v199_v39 }
  0xc1   :  { %513 = vpow2.f32 %v274_v36  ;;  %v276_v46 = vmul.f32 1.442695, %v270_v42  ;;  %v278_v47 = vmul.f32 1.442695, %v271_v43  ;;  %v850_v48 = vpop.xlane.xlu0 %334 }
  0xc2   :  { %515 = vpow2.f32 %v204_v44  ;;  %v340_v49 = vsub.f32 %v804_v19, %v850_v48  ;;  %v341_v50 = vsub.f32 %v798_v15, %v850_v48  ;;  %v856_v51 = vpop.xlane.xlu1 %338 }
  0xc3   :  { %517 = vpow2.f32 %v206_v45  ;;  %v343_v53 = vsub.f32 %v800_v16, %v856_v51  ;;  %v342_v56 = vsub.f32 %v808_v21, %v856_v51 }
  0xc4   :  { %519 = vpow2.f32 %v276_v46  ;;  %v344_v54 = vmul.f32 1.442695, %v340_v49  ;;  %v346_v55 = vmul.f32 1.442695, %v341_v50 }
  0xc5   :  { %521 = vpow2.f32 %v278_v47  ;;  %v350_v57 = vmul.f32 1.442695, %v343_v53  ;;  %v348_v60 = vmul.f32 1.442695, %v342_v56 }
  0xc6   :  { %523 = vpow2.f32 %v346_v55 }
  0xc7   :  { %525 = vpow2.f32 %v344_v54 }
  0xc8   :  { %v508_v59 = vpop.eup %507  ;;  %527 = vpow2.f32 %v350_v57 }
  0xc9   :  { %v510_v61 = vpop.eup %509  ;;  %v175_v62 = vpop.permute.xlu0 %174  ;;  %529 = vpow2.f32 %v348_v60 }
  0xca   :  { %v512_v63 = vpop.eup %511  ;;  %v208_v0 = vsel %vm187_vm0, %v510_v61, 0.0  ;;  %vm180_vm1 = vcmp.eq.s32.totalorder %v865_v58, %v175_v62  ;;  %vm179_vm2 = vcmp.eq.s32.totalorder %v858_v52, %v175_v62 }
  0xcb   :  { %v514_v4 = vpop.eup %513  ;;  %v209_v8 = vadd.f32 %v508_v59, %v208_v0  ;;  %v295_v9 = vsel %vm180_vm1, %v774_v5, 0.0  ;;  %v294_v22 = vsel %vm179_vm2, %v770_v3, 0.0  ;;  %v367_v5 = vsel %vm180_vm1, %v798_v15, 0.0  ;;  %v178_v15 = vpop.permute.xlu1 %177 }
  0xcc   :  { %v516_v10 = vpop.eup %515  ;;  %v280_v13 = vsel %vm187_vm0, %v514_v4, 0.0  ;;  %v298_v23 = vsel %vm187_vm0, %v295_v9, 0.0  ;;  %v366_v3 = vsel %vm179_vm2, %v804_v19, 0.0  ;;  %v370_v36 = vsel %vm187_vm0, %v367_v5, 0.0 }
  0xcd   :  { %v518_v14 = vpop.eup %517  ;;  %210 = vadd.xlane.f32.xlu1 %v209_v8  ;;  %v281_v17 = vadd.f32 %v512_v63, %v280_v13  ;;  %v299_v33 = vadd.f32 %v298_v23, %v294_v22  ;;  %v371_v41 = vadd.f32 %v370_v36, %v366_v3  ;;  %v223_v44 = vsel %vm180_vm1, %v768_v2, 0.0 }
  0xce   :  { %v520_v18 = vpop.eup %519  ;;  %v212_v20 = vsel %vm187_vm0, %v518_v14, 0.0  ;;  %vm182_vm3 = vcmp.eq.s32.totalorder %v865_v58, %v178_v15  ;;  %v222_v19 = vsel %vm179_vm2, %v763_v1, 0.0  ;;  %v226_v46 = vsel %vm187_vm0, %v223_v44, 0.0 }
  0xcf   :  { %v522_v24 = vpop.eup %521  ;;  %v213_v28 = vadd.f32 %v516_v10, %v212_v20  ;;  %vm181_vm4 = vcmp.eq.s32.totalorder %v858_v52, %v178_v15  ;;  %v225_v47 = vsel %vm182_vm3, %v784_v7, 0.0  ;;  %v227_v49 = vadd.f32 %v226_v46, %v222_v19 }
  0xd0   :  { %v284_v29 = vsel %vm187_vm0, %v522_v24, 0.0  ;;  %v524_v31 = vpop.eup %523  ;;  %v224_v2 = vsel %vm181_vm4, %v779_v6, 0.0  ;;  %v230_v50 = vsel %vm187_vm0, %v225_v47, 0.0  ;;  %v297_v1 = vsel %vm182_vm3, %v793_v12, 0.0 }
  0xd1   :  { %282 = vadd.xlane.f32.xlu1 %v281_v17  ;;  %214 = vadd.xlane.f32.xlu0 %v213_v28  ;;  %v285_v32 = vadd.f32 %v520_v18, %v284_v29  ;;  %v526_v34 = vpop.eup %525  ;;  %v352_v35 = vsel %vm187_vm0, %v524_v31, 0.0  ;;  %v231_v53 = vadd.f32 %v230_v50, %v224_v2  ;;  %v296_v54 = vsel %vm181_vm4, %v791_v11, 0.0 }
  0xd2   :  { %v528_v38 = vpop.eup %527  ;;  %v353_v39 = vadd.f32 %v526_v34, %v352_v35  ;;  %v302_v52 = vsel %vm187_vm0, %v297_v1, 0.0  ;;  %v369_v7 = vsel %vm182_vm3, %v800_v16, 0.0  ;;  %v368_v6 = vsel %vm181_vm4, %v808_v21, 0.0 }
  0xd3   :  { %v530_v42 = vpop.eup %529  ;;  %v356_v43 = vsel %vm187_vm0, %v528_v38, 0.0  ;;  %v303_v55 = vadd.f32 %v302_v52, %v296_v54  ;;  %v374_v56 = vsel %vm187_vm0, %v369_v7, 0.0  ;;  %v690_v11 = vmov 0.0  }
  0xd4   :  { %v357_v45 = vadd.f32 %v530_v42, %v356_v43  ;;  %v375_v57 = vadd.f32 %v374_v56, %v368_v6  ;;  %v484_v12 = vsel %vm142_vm6, 1.0, %v690_v11  ;;  %v485_v16 = vsel %vm143_vm5, 1.0, %v690_v11  ;;  %139 = vst.msk [vmem:[#allocation5] sm:$0x1] %vm135_vm10, %v690_v11  ;;  %136 = vst.msk [vmem:[#allocation2] sm:$0x1] %vm135_vm10, %v690_v11 }
  0xd5   :  { %286 = vadd.xlane.f32.xlu1 %v285_v32  ;;  %300 = vadd.xlane.f32.xlu0 %v299_v33  ;;  %v154_v21 = vsel %vm153_vm7, %v484_v12, 0.0  ;;  %v155_v58 = vsel %vm153_vm7, %v485_v16, 0.0  ;;  %v691_v23 = vmov 1.0   ;;  %137 = vst.msk [vmem:[#allocation3] sm:$0x1] %vm135_vm10, %v690_v11 }
  0xd6   :  { %v156_v59 = vadd.f32 %v155_v58, %v154_v21  ;;  %v146_v24 = vsel %vm144_vm8, 0.1, %v691_v23  ;;  %v147_v36 = vsel %vm145_vm9, 0.1, %v691_v23  ;;  %138 = vst.msk [vmem:[#allocation4] sm:$0x1] %vm135_vm10, %v690_v11 }
  0xd9   :  { %354 = vadd.xlane.f32.xlu1 %v353_v39  ;;  %372 = vadd.xlane.f32.xlu0 %v371_v41 }
  0xdb   :  { %v148_v25 = vld [vmem:[#allocation5] sm:$0x1] }
  0xdd   :  { %358 = vadd.xlane.f32.xlu1 %v357_v45  ;;  %157 = vadd.xlane.f32.xlu0 %v156_v59 }
  0xe1   :  { %228 = vadd.xlane.f32.xlu1 %v227_v49 }
  0xe5   :  { %232 = vadd.xlane.f32.xlu1 %v231_v53 }
  0xe9   :  { %304 = vadd.xlane.f32.xlu1 %v303_v55 }
  0xed   :  { %376 = vadd.xlane.f32.xlu1 %v375_v57 }
 0x15a   :  { %v211_v60 = vpop.xlane.xlu1 %210 }
 0x15b   :  { %531 = vlog2.f32 %v211_v60 }
 0x15e   :  { %v283_v61 = vpop.xlane.xlu1 %282  ;;  %v215_v62 = vpop.xlane.xlu0 %214 }
 0x15f   :  { %533 = vlog2.f32 %v283_v61 }
 0x160   :  { %535 = vlog2.f32 %v215_v62 }
 0x162   :  { %v287_v63 = vpop.xlane.xlu1 %286  ;;  %v301_v5 = vpop.xlane.xlu0 %300 }
 0x163   :  { %537 = vlog2.f32 %v287_v63 }
 0x165   :  { %v532_v0 = vpop.eup %531 }
 0x166   :  { %v355_v4 = vpop.xlane.xlu1 %354  ;;  %v217_v9 = vmul.f32 0.6931472, %v532_v0  ;;  %v373_v41 = vpop.xlane.xlu0 %372 }
 0x167   :  { %539 = vlog2.f32 %v355_v4 }
 0x168   :  { %v220_v20 = vadd.f32 %v217_v9, %v826_v27 }
 0x169   :  { %v534_v8 = vpop.eup %533 }
 0x16a   :  { %v536_v10 = vpop.eup %535  ;;  %v289_v13 = vmul.f32 0.6931472, %v534_v8  ;;  %v359_v14 = vpop.xlane.xlu1 %358 }
 0x16b   :  { %541 = vlog2.f32 %v359_v14  ;;  %v219_v17 = vmul.f32 0.6931472, %v536_v10  ;;  %v158_v59 = vpop.xlane.xlu0 %157 }
 0x16c   :  { %v292_v18 = vadd.f32 %v289_v13, %v832_v30  ;;  %v159_v60 = vrot.slane %v158_v59, 4 }
 0x16d   :  { %v538_v22 = vpop.eup %537  ;;  %v221_v35 = vadd.f32 %v219_v17, %v838_v37 }
 0x16e   :  { %v229_v28 = vpop.xlane.xlu1 %228  ;;  %v291_v32 = vmul.f32 0.6931472, %v538_v22  ;;  %v306_v33 = vsub.f32 %v292_v18, %v301_v5  ;;  %v160_v61 = vadd.f32 %v159_v60, %v158_v59 }
 0x16f   :  { %v234_v29 = vsub.f32 %v220_v20, %v229_v28 }
 0x170   :  { %v308_v15 = vmul.f32 %v306_v33, %v146_v24  ;;  %v293_v43 = vadd.f32 %v291_v32, %v844_v40  ;;  %v161_v62 = vrot.slane %v160_v61, 2 }
 0x171   :  { %v540_v31 = vpop.eup %539  ;;  %v236_v34 = vmul.f32 %v234_v29, %v146_v24 }
 0x172   :  { %v361_v3 = vmul.f32 0.6931472, %v540_v31  ;;  %v233_v38 = vpop.xlane.xlu1 %232  ;;  %v310_v40 = vsel %vm142_vm6, %v308_v15, 0.0  ;;  %v162_v63 = vadd.f32 %v161_v62, %v160_v61 }
 0x173   :  { %v235_v30 = vsub.f32 %v221_v35, %v233_v38  ;;  %v238_v44 = vsel %vm142_vm6, %v236_v34, 0.0  ;;  %v313_v55 = vsel %vm153_vm7, %v310_v40, 0.0 }
 0x174   :  { %v364_v27 = vadd.f32 %v361_v3, %v850_v48  ;;  %v241_v48 = vsel %vm153_vm7, %v238_v44, 0.0  ;;  %v163_v0 = vrot.slane %v162_v63, 1 }
 0x175   :  { %v542_v39 = vpop.eup %541  ;;  %v237_v42 = vmul.f32 %v235_v30, %v147_v36 }
 0x176   :  { %v363_v45 = vmul.f32 0.6931472, %v542_v39  ;;  %v378_v19 = vsub.f32 %v364_v27, %v373_v41  ;;  %v305_v46 = vpop.xlane.xlu1 %304  ;;  %v164_v4 = vadd.f32 %v163_v0, %v162_v63 }
 0x177   :  { %v307_v47 = vsub.f32 %v293_v43, %v305_v46  ;;  %v239_v37 = vsel %vm143_vm5, %v237_v42, 0.0 }
 0x178   :  { %v365_v49 = vadd.f32 %v363_v45, %v856_v51  ;;  %v242_v2 = vsel %vm153_vm7, %v239_v37, 0.0  ;;  %v380_v50 = vmul.f32 %v378_v19, %v146_v24  ;;  %486 = vpush %v164_v4 }
 0x179   :  { %v309_v53 = vmul.f32 %v307_v47, %v147_v36  ;;  %v243_v1 = vadd.f32 %v242_v2, %v241_v48 }
 0x17a   :  { %v377_v54 = vpop.xlane.xlu1 %376  ;;  %v382_v57 = vsel %vm142_vm6, %v380_v50, 0.0 }
 0x17b   :  { %v379_v52 = vsub.f32 %v365_v49, %v377_v54  ;;  %244 = vadd.xlane.f32.xlu1 %v243_v1  ;;  %v311_v7 = vsel %vm143_vm5, %v309_v53, 0.0  ;;  %v385_v16 = vsel %vm153_vm7, %v382_v57, 0.0 }
 0x17c   :  { %v314_v51 = vsel %vm153_vm7, %v311_v7, 0.0 }
 0x17d   :  { %v381_v6 = vmul.f32 %v379_v52, %v147_v36  ;;  %v315_v56 = vadd.f32 %v314_v51, %v313_v55 }
 0x17f   :  { %316 = vadd.xlane.f32.xlu0 %v315_v56  ;;  %v383_v12 = vsel %vm143_vm5, %v381_v6, 0.0 }
 0x180   :  { %v386_v21 = vsel %vm153_vm7, %v383_v12, 0.0 }
 0x181   :  { %v387_v58 = vadd.f32 %v386_v21, %v385_v16 }
 0x183   :  { %388 = vadd.xlane.f32.xlu1 %v387_v58 }
 0x1a9   :  { %s487_s0 = spop %486 }
 0x1aa   :  { %v166_v26 = vstv %s487_s0 }
 0x1ab   :  { %v167_v8 = vadd.f32 %v166_v26, %v148_v25 }
 0x1ad   :  { %169 = vst.msk [vmem:[#allocation5] sm:$0x1] %vm135_vm10, %v167_v8 }
 0x1b4   :  { %v409_v9 = vld [vmem:[#allocation5] sm:$0x1] }
 0x1b5   :  { %410 = vst.msk [vmem:[#allocation15] sm:$0x1] %vm135_vm10, %v409_v9 }
 0x1b6   :  { %598 = shalt.err (!%p595_p6)
}
 0x1b7   :  { %s599_s19 = scalar_lea.hbm %s1020_s7, 16 }
 0x1b8   :  { %p600_p7 = scmp.ne.s32.totalorder %s1020_s7, %s599_s19  ;;  %p603_p8 = scmp.lt.u32.totalorder %s599_s19, %s1020_s7 }
 0x1ba   :  { %p605_p9 = pnand %p603_p8, %p600_p7 }
 0x1bc   :  { %608 = shalt.err (!%p605_p9)
}
 0x1bd   :  { %450 = dma.vmem_to_hbm [thread:$0]  %s448_s14, 16, %s1020_s7, [#allocation16]   ;;  %v240_v30 = vld [vmem:[#allocation2] sm:$0x1]  ;;  %v312_v15 = vld [vmem:[#allocation3] sm:$0x1] }
 0x1be   :  { %v384_v43 = vld [vmem:[#allocation4] sm:$0x1]  ;;  %s693_s26 = smov [#allocation11]   ;;  %s694_s29 = smov [#allocation12]  }
 0x1bf   :  { %s417_s27 = sshll.u32 %s693_s26, 4  ;;  %s427_s3 = sshll.u32 %s694_s29, 4  ;;  %s418_s27 = int_to_ptr.vmem [resolvable:$true] %s417_s27  ;;  %s428_s3 = int_to_ptr.vmem [resolvable:$true] %s427_s3 }
 0x1c0   :  { %s609_s30 = scalar_lea.vmem %s418_s27, 16  ;;  %s613_s8 = scalar_lea.vmem %s418_s27, 32 }
 0x1c1   :  { %p610_p10 = scmp.ne.s32.totalorder %s418_s27, %s609_s30  ;;  %p614_p11 = scmp.lt.s32.totalorder %s418_s27, %s418_s27 }
 0x1c2   :  { %p615_p12 = scmp.lt.s32.totalorder %s613_s8, %s609_s30 }
 0x1c4   :  { %p616_p13 = por %p615_p12, %p614_p11 }
 0x1c6   :  { %p617_p0 = pnand %p616_p13, %p610_p10 }
 0x208   :  { %v245_v11 = vpop.xlane.xlu1 %244 }
 0x209   :  { %v246_v10 = vrot.slane %v245_v11, 4 }
 0x20b   :  { %v247_v13 = vadd.f32 %v246_v10, %v245_v11 }
 0x20c   :  { %v317_v14 = vpop.xlane.xlu0 %316 }
 0x20d   :  { %v248_v17 = vrot.slane %v247_v13, 2  ;;  %v318_v18 = vrot.slane %v317_v14, 4 }
 0x20f   :  { %v319_v20 = vadd.f32 %v318_v18, %v317_v14  ;;  %v249_v22 = vadd.f32 %v248_v17, %v247_v13 }
 0x210   :  { %v389_v23 = vpop.xlane.xlu1 %388 }
 0x211   :  { %v320_v24 = vrot.slane %v319_v20, 2  ;;  %v390_v28 = vrot.slane %v389_v23, 4  ;;  %v250_v5 = vrot.slane %v249_v22, 1 }
 0x213   :  { %v321_v29 = vadd.f32 %v320_v24, %v319_v20  ;;  %v391_v31 = vadd.f32 %v390_v28, %v389_v23  ;;  %v251_v32 = vadd.f32 %v250_v5, %v249_v22 }
 0x215   :  { %v392_v33 = vrot.slane %v391_v31, 2  ;;  %488 = vpush %v251_v32  ;;  %v322_v34 = vrot.slane %v321_v29, 1 }
 0x217   :  { %v393_v35 = vadd.f32 %v392_v33, %v391_v31  ;;  %v323_v3 = vadd.f32 %v322_v34, %v321_v29 }
 0x219   :  { %490 = vpush %v323_v3  ;;  %v394_v36 = vrot.slane %v393_v35, 1 }
 0x21b   :  { %v395_v38 = vadd.f32 %v394_v36, %v393_v35 }
 0x21d   :  { %492 = vpush %v395_v38 }
 0x246   :  { %s489_s7 = spop %488 }
 0x247   :  { %v253_v27 = vstv %s489_s7 }
 0x248   :  { %v254_v39 = vadd.f32 %v253_v27, %v240_v30 }
 0x24a   :  { %255 = vst.msk [vmem:[#allocation2] sm:$0x1] %vm135_vm10, %v254_v39  ;;  %s491_s25 = spop %490 }
 0x24b   :  { %v325_v41 = vstv %s491_s25 }
 0x24c   :  { %v326_v42 = vadd.f32 %v325_v41, %v312_v15 }
 0x24e   :  { %327 = vst.msk [vmem:[#allocation3] sm:$0x1] %vm135_vm10, %v326_v42  ;;  %s493_s28 = spop %492 }
 0x24f   :  { %v397_v44 = vstv %s493_s28 }
 0x250   :  { %v398_v45 = vadd.f32 %v397_v44, %v384_v43 }
 0x251   :  { %v403_v19 = vld [vmem:[#allocation2] sm:$0x1] }
 0x252   :  { %399 = vst.msk [vmem:[#allocation4] sm:$0x1] %vm135_vm10, %v398_v45  ;;  %404 = vst.msk [vmem:[#allocation11] sm:$0x1] %vm135_vm10, %v403_v19 }
 0x253   :  { %620 = shalt.err (!%p617_p0)
}
 0x254   :  { %s621_s10 = scalar_lea.hbm %s1017_s4, 16 }
 0x255   :  { %p622_p1 = scmp.ne.s32.totalorder %s1017_s4, %s621_s10  ;;  %p625_p2 = scmp.lt.u32.totalorder %s621_s10, %s1017_s4 }
 0x257   :  { %p627_p3 = pnand %p625_p2, %p622_p1 }
 0x259   :  { %630 = shalt.err (!%p627_p3)
}
 0x25a   :  { %420 = dma.vmem_to_hbm [thread:$0]  %s418_s27, 16, %s1017_s4, [#allocation8]   ;;  %v405_v46 = vld [vmem:[#allocation3] sm:$0x1] }
 0x25b   :  { %s695_s16 = smov [#allocation14]   ;;  %406 = vst.msk [vmem:[#allocation12] sm:$0x1] %vm135_vm10, %v405_v46  ;;  %s631_s18 = scalar_lea.vmem %s428_s3, 16 }
 0x25c   :  { %s437_s17 = sshll.u32 %s695_s16, 4  ;;  %p632_p4 = scmp.ne.s32.totalorder %s428_s3, %s631_s18  ;;  %s438_s17 = int_to_ptr.vmem [resolvable:$true] %s437_s17 }
 0x25d   :  { %s635_s19 = scalar_lea.vmem %s428_s3, 32  ;;  %p636_p5 = scmp.lt.s32.totalorder %s428_s3, %s428_s3 }
 0x25e   :  { %p637_p6 = scmp.lt.s32.totalorder %s635_s19, %s631_s18 }
 0x260   :  { %p638_p7 = por %p637_p6, %p636_p5 }
 0x262   :  { %p639_p8 = pnand %p638_p7, %p632_p4 }
 0x264   :  { %642 = shalt.err (!%p639_p8)
}
 0x265   :  { %s643_s22 = scalar_lea.hbm %s1018_s5, 16 }
 0x266   :  { %p644_p9 = scmp.ne.s32.totalorder %s1018_s5, %s643_s22  ;;  %p647_p10 = scmp.lt.u32.totalorder %s643_s22, %s1018_s5 }
 0x268   :  { %p649_p11 = pnand %p647_p10, %p644_p9 }
 0x26a   :  { %652 = shalt.err (!%p649_p11)
}
 0x26b   :  { %430 = dma.vmem_to_hbm [thread:$0]  %s428_s3, 16, %s1018_s5, [#allocation13]   ;;  %v407_v47 = vld [vmem:[#allocation4] sm:$0x1] }
 0x26c   :  { %408 = vst.msk [vmem:[#allocation14] sm:$0x1] %vm135_vm10, %v407_v47  ;;  %s653_s26 = scalar_lea.vmem %s438_s17, 16  ;;  %s657_s27 = scalar_lea.vmem %s438_s17, 32 }
 0x26d   :  { %p654_p12 = scmp.ne.s32.totalorder %s438_s17, %s653_s26  ;;  %p658_p13 = scmp.lt.s32.totalorder %s438_s17, %s438_s17 }
 0x26e   :  { %p659_p0 = scmp.lt.s32.totalorder %s657_s27, %s653_s26 }
 0x270   :  { %p660_p1 = por %p659_p0, %p658_p13 }
 0x272   :  { %p661_p2 = pnand %p660_p1, %p654_p12 }
 0x274   :  { %664 = shalt.err (!%p661_p2)
}
 0x275   :  { %s665_s30 = scalar_lea.hbm %s1019_s6, 16 }
 0x276   :  { %p666_p3 = scmp.ne.s32.totalorder %s1019_s6, %s665_s30  ;;  %p669_p4 = scmp.lt.u32.totalorder %s665_s30, %s1019_s6 }
 0x278   :  { %p671_p5 = pnand %p669_p4, %p666_p3 }
 0x27a   :  { %674 = shalt.err (!%p671_p5)
}
 0x27b   :  { %440 = dma.vmem_to_hbm [thread:$0]  %s438_s17, 16, %s1019_s6, [#allocation13]  }
 0x27c   :  { %679 = dma.done.wait [#allocation8], 16  }
 0x27d   :  { %680 = vsyncadd [#allocation8], 4294967280 }
 0x27e   :  { %681 = dma.done.wait [#allocation13], 32  }
 0x27f   :  { %682 = vsyncadd [#allocation13], 4294967264 }
 0x280   :  { %683 = dma.done.wait [#allocation16], 16  }
 0x281   :  { %684 = vsyncadd [#allocation16], 4294967280 }
 0x282   :  { %463 = vsyncpa [#allocation7], 1 }
 0x283   :  { %464 = vsyncpa [#allocation10], 1 }
 0x284   :  { %465 = vsyncpa [#allocation8], 1 }
 0x285   :  { %466 = vsyncpa [#allocation13], 1 }
 0x286   :  { %467 = vsyncpa [#allocation16], 1 }

</bundles_post_ra>
